<compile_context>
chip_gen: v7x
topology: tpu7x:2x2x1
jax: 0.10.0
libtpu: 0.0.40
codegen_flags: <defaults>
</compile_context>

<pallas_src>
import math

import jax
import jax.numpy as jnp
from jax.experimental import pallas as pl
from jax.experimental.pallas import tpu as pltpu


def _sinusoidal_kernel(x_ref, tab_ref, off_ref, out_ref):
    # x_ref:   (TB, 1)   f32 timesteps for this tile
    # tab_ref: (1, dim)  f32 [freqs | freqs]   (constant index_map -> resident)
    # off_ref: (1, dim)  f32 [  0   | pi/2 ]   (constant index_map -> resident)
    # out_ref: (TB, dim) single lane-dense whole-block store
    phase = x_ref[...] * tab_ref[...] + off_ref[...]       # VPU FMA, (TB, dim)
    out_ref[...] = jnp.sin(phase).astype(out_ref.dtype)    # EUP sin + one vst


def _round_up(v: int, m: int) -> int:
    return ((v + m - 1) // m) * m


def sinusoidal_pos_emb(
    x: jax.Array,
    dim: int,
    *,
    out_dtype=jnp.float32,
    force_pallas: bool = False,
) -> jax.Array:
    """Pallas equivalent of SinusoidalPosEmb(dim)(x): (B,) -> (B, dim)."""
    assert x.ndim == 1, "x must be a 1-D vector of timesteps"
    assert dim % 2 == 0, "dim must be even (output is [sin | cos])"
    half_dim = dim // 2
    assert half_dim > 1, "dim must be >= 4 (module divides by half_dim - 1)"

    B = int(x.shape[0])
    scale = math.log(10000.0) / (half_dim - 1)
    freqs = jnp.exp(jnp.arange(half_dim, dtype=jnp.float32) * (-scale))

    # Tiny problems: per-pallas_call overhead dominates, let XLA fuse it.
    if not force_pallas and B * dim < (1 << 20):
        emb = x.astype(jnp.float32)[:, None] * freqs[None, :]
        return jnp.concatenate([jnp.sin(emb), jnp.cos(emb)], axis=-1).astype(out_dtype)

    # Constant tables: cos(t) = sin(t + pi/2)  ->  one fused table / offset.
    tab = jnp.concatenate([freqs, freqs]).reshape(1, dim)
    off = jnp.concatenate(
        [jnp.zeros((half_dim,), jnp.float32),
         jnp.full((half_dim,), math.pi / 2, dtype=jnp.float32)]
    ).reshape(1, dim)

    # ---- batch tile: ~4 MiB of output per grid step, >= 2 steps when B > 8 ----
    out_itemsize = jnp.dtype(out_dtype).itemsize
    if B <= 8:
        TB = B                                          # block == full batch dim
    else:
        target_rows = max(8, (4 << 20) // (dim * out_itemsize))
        TB = min(_round_up(target_rows, 8), _round_up(B, 8))
        if pl.cdiv(B, TB) < 2:                          # feed both v7x TCs
            TB = _round_up(pl.cdiv(B, 2), 8)
    grid = (pl.cdiv(B, TB),)

    # ---- VMEM accounting (lane/sublane-padded) and device-aware cap ----
    vmem_bytes = (
        2 * TB * dim * out_itemsize      # double-buffered output tile
        + 2 * TB * 128 * 4               # (TB,1) x tile lane-pads to (TB,128)
        + 2 * 2 * 8 * dim * 4            # tab + off, sublane-padded, dbl-buffered
        + (2 << 20)                      # headroom
    )
    try:
        vmem_cap = int(getattr(pltpu.get_tpu_info(), "vmem_capacity_bytes", 64 << 20))
    except Exception:
        vmem_cap = 64 << 20              # v7x physical VMEM — safe lower bound
    vmem_bytes = min(max(vmem_bytes, 4 << 20), (vmem_cap * 9) // 10)

    cost = pl.CostEstimate(
        flops=2 * B * dim,               # one mul + one add per output element
        transcendentals=B * dim,         # one sin per output element
        bytes_accessed=B * dim * out_itemsize + B * 4 + 2 * dim * 4,
    )

    x2d = x.astype(jnp.float32).reshape(B, 1)

    return pl.pallas_call(
        _sinusoidal_kernel,
        out_shape=jax.ShapeDtypeStruct((B, dim), out_dtype),
        grid_spec=pltpu.PrefetchScalarGridSpec(
            num_scalar_prefetch=0,
            grid=grid,
            in_specs=[
                pl.BlockSpec((TB, 1), lambda i: (i, 0)),     # timestep tile
                pl.BlockSpec((1, dim), lambda i: (0, 0)),    # resident [f | f]
                pl.BlockSpec((1, dim), lambda i: (0, 0)),    # resident [0 | pi/2]
            ],
            out_specs=pl.BlockSpec((TB, dim), lambda i: (i, 0)),
        ),
        compiler_params=pltpu.CompilerParams(
            dimension_semantics=("parallel",),
            vmem_limit_bytes=int(vmem_bytes),
        ),
        cost_estimate=cost,
    )(x2d, tab, off)


def _reference(x: jax.Array, dim: int) -> jax.Array:
    half_dim = dim // 2
    emb = math.log(10000.0) / (half_dim - 1)
    emb = jnp.exp(jnp.arange(half_dim, dtype=jnp.float32) * -emb)
    emb = x.astype(jnp.float32)[:, None] * emb[None, :]
    return jnp.concatenate([jnp.sin(emb), jnp.cos(emb)], axis=-1)


if __name__ == "__main__":
    key = jax.random.PRNGKey(0)
    B, DIM = 16, 256  # (B,) timesteps -> (B, DIM); half_dim = 128 (lane-aligned)
    x = jax.random.uniform(key, (B,), jnp.float32, 0.0, 1000.0)

    out = jax.block_until_ready(sinusoidal_pos_emb(x, DIM, force_pallas=True))
    ref = _reference(x, DIM)
    assert out.shape == (B, DIM) and out.dtype == jnp.float32
    # cos(t) = sin(t + pi/2): f32 rounding of (t + pi/2) at |t| ~ 1e3 can shift
    # the argument by ~3e-5, so compare at 2e-4 abs (any real frequency /
    # indexing bug would be O(1)).
    assert jnp.allclose(out, ref, atol=2e-4, rtol=1e-5)

    # Ragged batch: exercises the clipped edge block (no wrapper pad / slice).
    B2 = 13
    x2 = jax.random.uniform(jax.random.PRNGKey(1), (B2,), jnp.float32, 0.0, 1000.0)
    out2 = jax.block_until_ready(sinusoidal_pos_emb(x2, DIM, force_pallas=True))
    assert out2.shape == (B2, DIM)
    assert jnp.allclose(out2, _reference(x2, DIM), atol=2e-4, rtol=1e-5)

    print("KERNEL_OK")
</pallas_src>

<mosaic_0001>
module attributes {stable_mosaic.version = 11 : i64} {
  func.func @_sinusoidal_kernel(%arg0: i32, %arg1: memref<8x1xf32, #tpu.memory_space<vmem>>, %arg2: memref<1x256xf32, #tpu.memory_space<vmem>>, %arg3: memref<1x256xf32, #tpu.memory_space<vmem>>, %arg4: memref<8x256xf32, #tpu.memory_space<vmem>>) attributes {dimension_semantics = [#tpu.dimension_semantics<parallel>], iteration_bounds = array<i64: 2>, scalar_prefetch = 0 : i64, scratch_operands = 0 : i64, tpu.core_type = #tpu.core_type<tc>, window_params = [{transform_indices = @transform_0, window_bounds = array<i64: 8, 1>}, {pipeline_mode = #tpu.pipeline_mode<synchronous>, transform_indices = @transform_1, window_bounds = array<i64: 1, 256>}, {pipeline_mode = #tpu.pipeline_mode<synchronous>, transform_indices = @transform_2, window_bounds = array<i64: 1, 256>}, {transform_indices = @transform_3, window_bounds = array<i64: 8, 256>}]} {
    %c0 = arith.constant 0 : index
    %c0_0 = arith.constant 0 : index
    %0 = vector.load %arg1[%c0, %c0_0] : memref<8x1xf32, #tpu.memory_space<vmem>>, vector<8x1xf32>
    %c0_1 = arith.constant 0 : index
    %c0_2 = arith.constant 0 : index
    %1 = vector.load %arg2[%c0_1, %c0_2] : memref<1x256xf32, #tpu.memory_space<vmem>>, vector<1x256xf32>
    %2 = vector.broadcast %0 : vector<8x1xf32> to vector<8x256xf32>
    %3 = vector.broadcast %1 : vector<1x256xf32> to vector<8x256xf32>
    %4 = arith.mulf %2, %3 : vector<8x256xf32>
    %c0_3 = arith.constant 0 : index
    %c0_4 = arith.constant 0 : index
    %5 = vector.load %arg3[%c0_3, %c0_4] : memref<1x256xf32, #tpu.memory_space<vmem>>, vector<1x256xf32>
    %6 = vector.broadcast %5 : vector<1x256xf32> to vector<8x256xf32>
    %7 = arith.addf %4, %6 : vector<8x256xf32>
    %8 = math.sin %7 : vector<8x256xf32>
    %c0_5 = arith.constant 0 : index
    %c0_6 = arith.constant 0 : index
    %9 = vector.load %arg4[%c0_5, %c0_6] : memref<8x256xf32, #tpu.memory_space<vmem>>, vector<8x256xf32>
    tpu.vector_store %arg4[%c0_5, %c0_6], %8 {strides = array<i32>} : memref<8x256xf32, #tpu.memory_space<vmem>>, vector<8x256xf32>,
    return
  }
  func.func @transform_0(%arg0: i32) -> (i32, i32) {
    %c0_i32 = arith.constant 0 : i32
    %c0_i32_0 = arith.constant 0 : i32
    return %arg0, %c0_i32 : i32, i32
  }
  func.func @transform_1(%arg0: i32) -> (i32, i32) {
    %c0_i32 = arith.constant 0 : i32
    %c0_i32_0 = arith.constant 0 : i32
    %c0_i32_1 = arith.constant 0 : i32
    return %c0_i32, %c0_i32_0 : i32, i32
  }
  func.func @transform_2(%arg0: i32) -> (i32, i32) {
    %c0_i32 = arith.constant 0 : i32
    %c0_i32_0 = arith.constant 0 : i32
    %c0_i32_1 = arith.constant 0 : i32
    return %c0_i32, %c0_i32_0 : i32, i32
  }
  func.func @transform_3(%arg0: i32) -> (i32, i32) {
    %c0_i32 = arith.constant 0 : i32
    %c0_i32_0 = arith.constant 0 : i32
    return %arg0, %c0_i32 : i32, i32
  }
}

</mosaic_0001>

<bundles_post_ra>
// kernel: tpu_custom_call.1
= control target key start
LH: loop header
LB: loop body
LE: loop exit
PB: predicated region body
PF: predicated region fallthrough
CT: control target
= control target key end

     0   :  { %8 = vsyncpa [#allocation3], 0  ;;  %s839_s0 = inlined_call_operand.vmem [shape: f32[16,1], index: 0, kind: input, shape index: {}]   ;;  %s840_s1 = inlined_call_operand.vmem [shape: f32[1,256], index: 1, kind: input, shape index: {}]   ;;  %s841_s2 = inlined_call_operand.vmem [shape: f32[1,256], index: 2, kind: input, shape index: {}]   ;;  %s842_s3 = inlined_call_operand.hbm [shape: f32[16,256], index: 3, kind: output, shape index: {}]  }
   0x1   :  { %10 = vsyncpa [#allocation3 + $0x1], 0  ;;  %s659_s12 = smov 0   ;;  %s661_s13 = smov 0  }
   0x2   :  { %s663_s14 = smov 0   ;;  %s665_s15 = smov 0  }
   0x3 LB: > { %s680_s16 = sadd.s32 4294967295, %s629_s15   ;;  %s484_s17 = sadd.s32 4294967294, %s629_s15   ;;  %s629_s15 = sphi %s665_s15, %s850_s15   ;;  %s625_s14 = sphi %s663_s14, %s849_s14   ;;  %s621_s13 = sphi %s661_s13, %s848_s13   ;;  %s617_s12 = sphi %s659_s12, %s847_s12  }
   0x4   : > { %s684_s18 = sadd.s32 1, %s629_s15   ;;  %s91_s19 = sadd.s32 1, %s625_s14 }
   0x5   : > { %s88_s20 = ssub.s32 %s629_s15, %s684_s18  ;;  %p101_p0 = scmp.ne.s32.totalorder %s625_s14, %s621_s13 }
   0x6   : > { %p89_p1 = scmp.eq.s32.totalorder %s88_s20, 0  ;;  %p102_p2 = scmp.eq.s32.totalorder %s680_s16, 1 }
   0x7   : > { %p107_p3 = scmp.ne.s32.totalorder %s621_s13, %s617_s12  ;;  %p108_p4 = scmp.eq.s32.totalorder %s484_s17, 1 }
   0x8   : > { %s695_s21 = scalar_select %p89_p1, %s625_s14, %s91_s19  }
   0x9   : > { %p697_p5 = por %p102_p2, %p101_p0  ;;  %p701_p6 = por %p108_p4, %p107_p3 }
   0xa   : > { %p487_p7 = scmp.ge.s32.totalorder %s629_s15, 1  ;;  %p139_p8 = scmp.lt.s32.totalorder %s629_s15, 3 }
   0xc   : > { %p140_p9 = pnand %p487_p7, %p139_p8 }
   0xd   : > { %p162_p10 = scmp.lt.s32.totalorder (!%p140_p9), %s680_s16, 1  ;;  %v631_v0 = vmov (!%p140_p9), 0   ;;  %v174_v2 = vlaneseq (!%p140_p9)  ;;  %v167_v6 = vld [vmem:[%s840_s1] sm:$0x3] (!%p140_p9)  ;;  %v632_v37 = vmov (!%p140_p9), 683565275  }
   0xe   : > { %143 = sbr.rel (%p140_p9) target bundleno = 261 (0x105), region = 32  ;;  %558 = vset.pattern.permute.xlu0 (!%p140_p9), %v631_v0  ;;  %v186_v7 = vld [vmem:[%s841_s2] sm:$0x3] (!%p140_p9)  ;;  %v633_v41 = vmov (!%p140_p9), 2475754826   ;;  %s159_s6 = sand.u32 (!%p140_p9), 1, %s621_s13  }
   0xf   : > { %v175_v3 = vshrl.u32 (!%p140_p9), %v174_v2, 7  ;;  %v634_v43 = vmov (!%p140_p9), 2131351028   ;;  %v635_v45 = vmov (!%p140_p9), 2102212464   ;;  %s488_s7 = sshll.u32 (!%p140_p9), %s159_s6, 4 }
  0x10   : > { %v636_v47 = vmov (!%p140_p9), 920167782   ;;  %v637_v54 = vmov (!%p140_p9), 1326507024   ;;  %s161_s8 = scalar_lea.vmem (!%p140_p9), [#allocation2], %s488_s7  ;;  %s503_s9 = sshll.u32 (!%p140_p9), %s680_s16, 8 }
  0x11   : > { %v176_v4 = vsub.s32 (!%p140_p9), 0, %v175_v3  ;;  %v180_v5 = vsub.s32 (!%p140_p9), 1, %v175_v3  ;;  %s425_s10 = sshll.u32 (!%p140_p9), %s161_s8, 4  ;;  %s795_s19 = scalar_lea.hbm (!%p140_p9), %s842_s3, %s503_s9  ;;  %s797_s10 = int_to_ptr.vmem [resolvable:$true] %s425_s10 }
  0x12   : > { %s567_s20 = scalar_lea.vmem (!%p140_p9), %s797_s10, 256 }
  0x13   : > { %v177_v8 = vrot.slane (!%p140_p9), %v167_v6, %v176_v4  ;;  %v181_v9 = vrot.slane (!%p140_p9), %v167_v6, %v180_v5  ;;  %v191_v10 = vrot.slane (!%p140_p9), %v186_v7, %v176_v4  ;;  %v195_v11 = vrot.slane (!%p140_p9), %v186_v7, %v180_v5  ;;  %p568_p11 = scmp.ne.s32.totalorder (!%p140_p9), %s797_s10, %s567_s20 }
  0x15   : > { %s163_s24 = scalar_select %p162_p10, %s680_s16, 1 }
  0x16   : > { %s411_s16 = scalar_lea.sflag [#allocation3], %s159_s6  ;;  %p569_p12 = pnand %p568_p11, %p697_p5 }
  0x17   : > { %s489_s25 = sshll.u32 %s163_s24, 3  ;;  %s638_s24 = smov [#allocation2]  }
  0x18   : > { %s165_s28 = scalar_lea.vmem %s839_s0, %s489_s25  ;;  %p570_p13 = pneg %p569_p12 }
  0x19   : > { %v166_v1 = vld [vmem:[%s165_s28] sm:$0xff]  ;;  %s571_s25 = sshll.u32 %s638_s24, 4  ;;  %s572_s25 = int_to_ptr.vmem [resolvable:$false] %s571_s25 }
  0x1a   : > { %170 = vperm.xlu0 %558, %v166_v1   ;;  %s573_s26 = scalar_lea.vmem %s572_s25, 512  ;;  %p574_p0 = scmp.lt.s32.totalorder %s797_s10, %s572_s25 }
  0x1b   : > { %p575_p1 = scmp.lt.s32.totalorder %s573_s26, %s567_s20 }
  0x1d   : > { %p576_p2 = por %p575_p1, %p574_p0 }
  0x1f   : > { %p577_p3 = pnand %p576_p2, %p570_p13 }
  0x99   : > { %v171_v12 = vpop.permute.xlu0 %170 }
  0x9a   : > { %v184_v13 = vmul.f32 %v177_v8, %v171_v12  ;;  %v185_v14 = vmul.f32 %v181_v9, %v171_v12 }
  0x9c   : > { %v718_v15 = vadd.f32 %v191_v10, %v184_v13  ;;  %v720_v16 = vadd.f32 %v195_v11, %v185_v14 }
  0x9e   : > { %v200_v17 = vand.u32 2147483647, %v718_v15  ;;  %v203_v18 = vand.u32 2139095040, %v718_v15  ;;  %v307_v19 = vand.u32 2139095040, %v720_v16  ;;  %v304_v22 = vand.u32 2147483647, %v720_v16 }
  0x9f   : > { %vm202_vm14 = vcmp.lt.s32.totalorder %v718_v15, 0 }
  0xa0   : > { %v204_v20 = vshrl.u32 %v203_v18, 23  ;;  %v207_v21 = vand.u32 8388607, %v200_v17  ;;  %v308_v23 = vshrl.u32 %v307_v19, 23  ;;  %v730_v28 = vand.u32 8388607, %v304_v22 }
  0xa1   : > { %vm201_vm15 = vcmp.le.f32.partialorder %v200_v17, 0.7853982 }
  0xa2   : > { %v490_v24 = vadd.s32 4294967169, %v204_v20  ;;  %v494_v25 = vadd.s32 4294967169, %v308_v23  ;;  %v208_v27 = vor.u32 8388608, %v207_v21  ;;  %v312_v35 = vor.u32 8388608, %v730_v28 }
  0xa4   : > { %v210_v26 = vadd.s32 1, %v490_v24  ;;  %v314_v29 = vadd.s32 1, %v494_v25  ;;  %v732_v34 = vshll.u32 %v208_v27, 8 }
  0xa6   : > { %vm211_vm0 = vcmp.gt.s32.totalorder %v210_v26, 0  ;;  %vm315_vm1 = vcmp.gt.s32.totalorder %v314_v29, 0 }
  0xa7   : > { %v212_v30 = vsel %vm211_vm0, %v210_v26, 0  ;;  %v316_v33 = vsel %vm315_vm1, %v314_v29, 0  ;;  %v352_v29 = vshll.u32 %v312_v35, 8  ;;  %vm306_vm0 = vcmp.lt.s32.totalorder %v720_v16, 0 }
  0xa8   : > { %v213_v31 = vshrl.u32 %v212_v30, 5  ;;  %v214_v32 = vand.u32 31, %v212_v30  ;;  %v735_v39 = vshrl.u32 %v316_v33, 5  ;;  %v318_v40 = vand.u32 31, %v316_v33 }
  0xa9   : > { %vm777_vm1 = vcmp.le.f32.partialorder %v304_v22, 0.7853982 }
  0xaa   : > { %v215_v36 = vsub.s32 32, %v214_v32  ;;  %v217_v38 = vshll.u32 %v632_v37, %v214_v32  ;;  %v220_v42 = vshll.u32 %v633_v41, %v214_v32  ;;  %v223_v44 = vshll.u32 %v634_v43, %v214_v32 }
  0xab   : > { %v226_v46 = vshll.u32 %v635_v45, %v214_v32  ;;  %v229_v48 = vshll.u32 %v636_v47, %v214_v32  ;;  %vm232_vm2 = vcmp.lt.s32.totalorder %v213_v31, 1  ;;  %vm233_vm3 = vcmp.lt.s32.totalorder %v213_v31, 2 }
  0xac   : > { %v218_v49 = vshrl.u32 %v633_v41, %v215_v36  ;;  %v221_v50 = vshrl.u32 %v634_v43, %v215_v36  ;;  %v224_v51 = vshrl.u32 %v635_v45, %v215_v36  ;;  %v216_v52 = vshrl.u32 %v632_v37, %v215_v36 }
  0xad   : > { %v227_v53 = vshrl.u32 %v636_v47, %v215_v36  ;;  %v230_v55 = vshrl.u32 %v637_v54, %v215_v36  ;;  %v319_v59 = vsub.s32 32, %v318_v40  ;;  %vm234_vm4 = vcmp.lt.s32.totalorder %v213_v31, 3 }
  0xae   : > { %v219_v56 = vor.u32 %v218_v49, %v217_v38  ;;  %v222_v57 = vor.u32 %v221_v50, %v220_v42  ;;  %v225_v58 = vor.u32 %v224_v51, %v223_v44  ;;  %vm235_vm5 = vcmp.lt.s32.totalorder %v213_v31, 4 }
  0xaf   : > { %v228_v60 = vor.u32 %v227_v53, %v226_v46  ;;  %v231_v61 = vor.u32 %v230_v55, %v229_v48  ;;  %v321_v5 = vshll.u32 %v632_v37, %v318_v40  ;;  %v322_v8 = vshrl.u32 %v633_v41, %v319_v59 }
  0xb0   : > { %v236_v62 = vsel %vm232_vm2, %v216_v52, %v219_v56  ;;  %v237_v63 = vsel %vm235_vm5, %v225_v58, 2102212464  ;;  %v240_v0 = vsel %vm232_vm2, %v219_v56, %v222_v57  ;;  %v244_v1 = vsel %vm232_vm2, %v222_v57, %v225_v58 }
  0xb1   : > { %v238_v2 = vsel %vm234_vm4, %v222_v57, %v237_v63  ;;  %v241_v3 = vsel %vm235_vm5, %v228_v60, 920167782  ;;  %v245_v4 = vsel %vm235_vm5, %v231_v61, 1326507024  ;;  %v324_v9 = vshll.u32 %v633_v41, %v318_v40 }
  0xb2   : > { %v242_v6 = vsel %vm234_vm4, %v225_v58, %v241_v3  ;;  %v246_v7 = vsel %vm234_vm4, %v228_v60, %v245_v4  ;;  %v239_v10 = vsel %vm233_vm3, %v236_v62, %v238_v2  ;;  %v325_v13 = vshrl.u32 %v634_v43, %v319_v59 }
  0xb3   : > { %v243_v11 = vsel %vm233_vm3, %v240_v0, %v242_v6  ;;  %v247_v12 = vsel %vm233_vm3, %v244_v1, %v246_v7  ;;  %v323_v21 = vor.u32 %v322_v8, %v321_v5  ;;  %v327_v24 = vshll.u32 %v634_v43, %v318_v40 }
  0xb4   : > { %v744_v14 = vmul.u32.u64.low %v732_v34, %v247_v12  ;;  %v745_v18 = vmul.u32.u64.high %v732_v34, %v247_v12, %v744_v14  ;;  %v748_v19 = vmul.u32.u64.low %v732_v34, %v243_v11  ;;  %v749_v20 = vmul.u32.u64.high %v732_v34, %v243_v11, %v748_v19 }
  0xb5   : > { %v326_v23 = vor.u32 %v325_v13, %v324_v9  ;;  %v328_v25 = vshrl.u32 %v635_v45, %v319_v59  ;;  %v330_v26 = vshll.u32 %v635_v45, %v318_v40  ;;  %v331_v27 = vshrl.u32 %v636_v47, %v319_v59 }
  0xb6   : > { %v334_v28 = vshrl.u32 %v637_v54, %v319_v59  ;;  %v255_v30 = vmul.u32 %v732_v34, %v239_v10  ;;  %v320_v31 = vshrl.u32 %v632_v37, %v319_v59  ;;  %v333_v33 = vshll.u32 %v636_v47, %v318_v40 }
  0xb7   : > { %v329_v32 = vor.u32 %v328_v25, %v327_v24  ;;  %vm257_vm6 = vc.u32 %v745_v18, %v748_v19  ;;  %v258_v36 = vadd.s32 1, %v749_v20  ;;  %v332_v38 = vor.u32 %v331_v27, %v330_v26 }
  0xb8   : > { %vm336_vm7 = vcmp.lt.s32.totalorder %v735_v39, 1  ;;  %v335_v41 = vor.u32 %v334_v28, %v333_v33  ;;  %vm338_vm8 = vcmp.lt.s32.totalorder %v735_v39, 3  ;;  %vm339_vm9 = vcmp.lt.s32.totalorder %v735_v39, 4 }
  0xb9   : > { %v344_v42 = vsel %vm336_vm7, %v323_v21, %v326_v23  ;;  %v259_v35 = vsel %vm257_vm6, %v258_v36, %v749_v20  ;;  %v341_v43 = vsel %vm339_vm9, %v329_v32, 2102212464  ;;  %v345_v34 = vsel %vm339_vm9, %v332_v38, 920167782 }
  0xba   : > { %v348_v37 = vsel %vm336_vm7, %v326_v23, %v329_v32  ;;  %v260_v44 = vadd.s32 %v259_v35, %v255_v30  ;;  %vm337_vm10 = vcmp.lt.s32.totalorder %v735_v39, 2  ;;  %v346_v40 = vsel %vm338_vm8, %v329_v32, %v345_v34 }
  0xbb   : > { %v349_v45 = vsel %vm339_vm9, %v335_v41, 1326507024  ;;  %v340_v46 = vsel %vm336_vm7, %v320_v31, %v323_v21  ;;  %v342_v47 = vsel %vm338_vm8, %v326_v23, %v341_v43  ;;  %v347_v48 = vsel %vm337_vm10, %v344_v42, %v346_v40 }
  0xbc   : > { %v350_v49 = vsel %vm338_vm8, %v332_v38, %v349_v45  ;;  %v261_v50 = vadd.s32 536870912, %v260_v44  ;;  %v759_v52 = vmul.u32.u64.low %v352_v29, %v347_v48  ;;  %v760_v53 = vmul.u32.u64.high %v352_v29, %v347_v48, %v759_v52 }
  0xbd   : > { %v351_v51 = vsel %vm337_vm10, %v348_v37, %v350_v49  ;;  %v343_v57 = vsel %vm337_vm10, %v340_v46, %v342_v47  ;;  %v256_v9 = vadd.s32 %v748_v19, %v745_v18  ;;  %vm292_vm5 = vweird.f32 %v718_v15 }
  0xbe   : > { %v762_v54 = vmul.u32.u64.low %v352_v29, %v351_v51  ;;  %v763_v55 = vmul.u32.u64.high %v352_v29, %v351_v51, %v762_v54  ;;  %v262_v56 = vshrl.u32 %v261_v50, 30  ;;  %v362_v59 = vadd.s32 1, %v760_v53 }
  0xbf   : > { %v359_v39 = vmul.u32 %v352_v29, %v343_v57  ;;  %vm396_vm9 = vweird.f32 %v720_v16 }
  0xc0   : > { %v263_v58 = vshll.u32 %v262_v56, 30  ;;  %vm361_vm11 = vc.u32 %v763_v55, %v759_v52  ;;  %v360_v30 = vadd.s32 %v759_v52, %v763_v55  ;;  %v286_v19 = vsub.s32 4, %v262_v56 }
  0xc1   : > { %v363_v61 = vsel %vm361_vm11, %v362_v59, %v760_v53 }
  0xc2   : > { %v264_v60 = vsub.s32 %v260_v44, %v263_v58  ;;  %v364_v62 = vadd.s32 %v363_v61, %v359_v39  ;;  %v287_v34 = vsel %vm202_vm14, %v286_v19, %v262_v56 }
  0xc3   : > { %v289_v46 = vsel %vm201_vm15, 0, %v287_v34 }
  0xc4   : > { %v266_v63 = vsub.s32 0, %v264_v60  ;;  %v365_v0 = vadd.s32 536870912, %v364_v62  ;;  %v293_v49 = vadd.s32 3, %v289_v46 }
  0xc6   : > { %v491_v1 = vmin.u32 %v266_v63, %v264_v60  ;;  %v366_v2 = vshrl.u32 %v365_v0, 30  ;;  %v294_v54 = vand.u32 3, %v293_v49 }
  0xc8   : > { %v268_v3 = vclz %v491_v1  ;;  %v367_v4 = vshll.u32 %v366_v2, 30  ;;  %v390_v48 = vsub.s32 4, %v366_v2  ;;  %vm299_vm2 = vcmp.eq.s32.totalorder %v294_v54, 2 }
  0xc9   : > { %vm296_vm3 = vcmp.eq.s32.totalorder %v294_v54, 0  ;;  %vm295_vm4 = vcmp.lt.s32.totalorder %v294_v54, 2 }
  0xca   : > { %v492_v5 = vadd.s32 4294967294, %v268_v3  ;;  %v368_v6 = vsub.s32 %v364_v62, %v367_v4  ;;  %v391_v52 = vsel %vm306_vm0, %v390_v48, %v366_v2 }
  0xcb   : > { %v393_v56 = vsel %vm777_vm1, 0, %v391_v52 }
  0xcc   : > { %vm493_vm12 = vcmp.lt.s32.totalorder %v492_v5, 0  ;;  %v370_v8 = vsub.s32 0, %v368_v6  ;;  %v397_v39 = vadd.s32 3, %v393_v56 }
  0xcd   : > { %v271_v7 = vsel %vm493_vm12, 0, %v492_v5 }
  0xce   : > { %v272_v10 = vsub.s32 32, %v271_v7  ;;  %v276_v11 = vsub.s32 4294967266, %v271_v7  ;;  %v495_v12 = vmin.u32 %v370_v8, %v368_v6  ;;  %v273_v13 = vshll.u32 %v264_v60, %v271_v7 }
  0xcf   : > { %v398_v63 = vand.u32 3, %v397_v39 }
  0xd0   : > { %v274_v14 = vshrl.u32 %v256_v9, %v272_v10  ;;  %v277_v20 = vadd.s32 127, %v276_v11  ;;  %v372_v21 = vclz %v495_v12 }
  0xd1   : > { %vm403_vm6 = vcmp.eq.s32.totalorder %v398_v63, 2  ;;  %vm400_vm7 = vcmp.eq.s32.totalorder %v398_v63, 0  ;;  %vm399_vm8 = vcmp.lt.s32.totalorder %v398_v63, 2 }
  0xd2   : > { %v275_v23 = vor.u32 %v274_v14, %v273_v13  ;;  %v278_v24 = vshll.u32 %v277_v20, 23  ;;  %v496_v25 = vadd.s32 4294967294, %v372_v21 }
  0xd4   : > { %v279_v26 = vor.u32 4788187, %v278_v24  ;;  %vm497_vm13 = vcmp.lt.s32.totalorder %v496_v25, 0  ;;  %v282_v28 = vcvt.s32.f32 %v275_v23 }
  0xd5   : > { %v375_v29 = vsel %vm497_vm13, 0, %v496_v25 }
  0xd6   : > { %v280_v27 = vand.u32 2147483647, %v279_v26  ;;  %v376_v31 = vsub.s32 32, %v375_v29  ;;  %v380_v32 = vsub.s32 4294967266, %v375_v29  ;;  %v377_v33 = vshll.u32 %v368_v6, %v375_v29 }
  0xd8   : > { %v283_v18 = vmul.f32 %v282_v28, %v280_v27  ;;  %v378_v36 = vshrl.u32 %v360_v30, %v376_v31  ;;  %v381_v38 = vadd.s32 127, %v380_v32 }
  0xda   : > { %v284_v41 = vxor.u32 2147483648, %v283_v18  ;;  %v379_v42 = vor.u32 %v378_v36, %v377_v33  ;;  %v382_v35 = vshll.u32 %v381_v38, 23 }
  0xdc   : > { %v285_v43 = vsel %vm202_vm14, %v284_v41, %v283_v18  ;;  %v383_v44 = vor.u32 4788187, %v382_v35  ;;  %v386_v45 = vcvt.s32.f32 %v379_v42 }
  0xdd   : > { %v288_v37 = vsel %vm201_vm15, %v718_v15, %v285_v43 }
  0xde   : > { %559 = vcosq.f32 %v288_v37  ;;  %v384_v40 = vand.u32 2147483647, %v383_v44 }
  0xdf   : > { %561 = vsinq.f32 %v288_v37 }
  0xe0   : > { %v387_v47 = vmul.f32 %v386_v45, %v384_v40 }
  0xe2   : > { %v388_v50 = vxor.u32 2147483648, %v387_v47 }
  0xe4   : > { %v389_v51 = vsel %vm306_vm0, %v388_v50, %v387_v47 }
  0xe5   : > { %v392_v53 = vsel %vm777_vm1, %v720_v16, %v389_v51 }
  0xe6   : > { %563 = vcosq.f32 %v392_v53 }
  0xe7   : > { %565 = vsinq.f32 %v392_v53 }
  0xe8   : > { %v560_v55 = vpop.eup %559 }
  0xe9   : > { %v562_v57 = vpop.eup %561  ;;  %v300_v22 = vxor.u32 2147483648, %v560_v55 }
  0xea   : > { %v297_v58 = vxor.u32 2147483648, %v562_v57 }
  0xeb   : > { %v301_v59 = vsel %vm299_vm2, %v300_v22, %v562_v57 }
  0xec   : > { %v298_v60 = vsel %vm296_vm3, %v560_v55, %v297_v58 }
  0xed   : > { %v302_v61 = vsel %vm295_vm4, %v298_v60, %v301_v59 }
  0xee   : > { %v303_v62 = vsel %vm292_vm5, nan, %v302_v61 }
  0xef   : > { %408 = vst [vmem:[%s161_s8] sm:$0xff] %v303_v62 }
  0xf0   : > { %v564_v0 = vpop.eup %563 }
  0xf1   : > { %v566_v1 = vpop.eup %565  ;;  %v404_v2 = vxor.u32 2147483648, %v564_v0 }
  0xf2   : > { %v401_v3 = vxor.u32 2147483648, %v566_v1 }
  0xf3   : > { %v405_v4 = vsel %vm403_vm6, %v404_v2, %v566_v1 }
  0xf4   : > { %v402_v5 = vsel %vm400_vm7, %v564_v0, %v401_v3 }
  0xf5   : > { %v406_v15 = vsel %vm399_vm8, %v402_v5, %v405_v4 }
  0xf6   : > { %v407_v6 = vsel %vm396_vm9, nan, %v406_v15 }
  0xf7   : > { %409 = vst [vmem:[%s161_s8 + $0x8] sm:$0xff] %v407_v6 }
  0xf8   : > { %580 = shalt.err (!%p577_p3)
}
  0xf9   : > { %s581_s27 = scalar_lea.hbm %s795_s19, 256  ;;  %s585_s30 = scalar_lea.hbm %s842_s3, 512 }
  0xfa   : > { %p582_p4 = scmp.ne.s32.totalorder %s795_s19, %s581_s27  ;;  %p586_p9 = scmp.lt.u32.totalorder %s795_s19, %s842_s3 }
  0xfb   : > { %p587_p10 = scmp.lt.u32.totalorder %s585_s30, %s581_s27  ;;  %p589_p12 = scmp.lt.u32.totalorder %s581_s27, %s795_s19 }
  0xfc   : > { %p583_p7 = pnand %p582_p4, %p697_p5 }
  0xfd   : > { %p588_p11 = por %p587_p10, %p586_p9 }
  0xfe   : > { %p584_p8 = pneg %p583_p7 }
  0xff   : > { %p590_p13 = por %p589_p12, %p588_p11 }
 0x101   : > { %p591_p0 = pnand %p590_p13, %p584_p8 }
 0x103   : > { %594 = shalt.err (!%p591_p0)
}
 0x104   : > { %512 = dma.vmem_to_hbm [thread:$0]  (%p697_p5), %s797_s10, 256, %s795_s19, %s411_s16  }
 0x105 PF: > { %p518_p1 = scmp.ge.s32.totalorder %s629_s15, 2  ;;  %s437_s6 = sand.u32 1, %s617_s12  }
 0x106   : > { %s438_s7 = scalar_lea.sflag [#allocation3], %s437_s6 }
 0x107   : > { %p515_p2 = pnand %p518_p1, %p701_p6 }
 0x109   : > { %612 = dma.done.wait (!%p515_p2), %s438_s7, 256  }
 0x10a   : > { %614 = vsyncadd (!%p515_p2), %s438_s7, 4294967040  ;;  %p13_p3 = scmp.ge.s32.totalorder %s684_s18, 4   ;;  %s847_s12 = smov %s621_s13 }
 0x10b   : > { %s848_s13 = smov %s625_s14  ;;  %s849_s14 = smov %s695_s21 }
 0x10c   : > { %s850_s15 = smov %s684_s18  ;;  %15 = sbr.rel (!%p13_p3) target bundleno = 3 (0x3), region = 67 }
 0x113   :  { %443 = vsyncpa [#allocation3], 1 }
 0x114   :  { %445 = vsyncpa [#allocation3 + $0x1], 1 }

</bundles_post_ra>
